<compile_context>
chip_gen: v5e
topology: v5e:2x2
jax: 0.10.0
libtpu: 0.0.40
codegen_flags: <defaults>
</compile_context>

<pallas_src>
import jax
import jax.numpy as jnp
from jax.experimental import pallas as pl
from jax.experimental.pallas import tpu as pltpu

LANES = 128                  # vreg lane width
DEFAULT_TILE_ROWS = 8192     # (8192, 128) f32 = 4 MiB/block buffer
MIN_KERNEL_ELEMS = 1 << 16   # below this, pallas_call launch overhead dominates


def logreg_kernel(w_ref, b_ref, x_ref, o_ref):
    # w_ref, b_ref: scalar-prefetch refs in SMEM, shape (1,).
    # x_ref, o_ref: (block_rows, 128) f32 tiles in VMEM.
    w = w_ref[0]
    b = b_ref[0]
    z = x_ref[...] * w + b                      # Linear(1,1): x*W + b (elementwise FMA)
    # sigmoid(z) == 0.5*tanh(z/2) + 0.5 : single EUP transcendental, no VALU divide.
    o_ref[...] = 0.5 * jnp.tanh(0.5 * z) + 0.5


def logistic_regression(x, w, b, *, tile_rows=DEFAULT_TILE_ROWS,
                        min_kernel_elems=MIN_KERNEL_ELEMS):
    """x: (N, 1) f32, w: (1, 1) f32, b: (1,) f32 -> sigmoid(x @ w.T + b), shape (N, 1)."""
    orig_shape = x.shape
    dtype = x.dtype
    w_scalar = w.reshape(()).astype(dtype)
    b_scalar = b.reshape(()).astype(dtype)

    flat = x.reshape(-1)
    total = flat.shape[0]

    # Small-input fallback: a single fused XLA elementwise op beats the
    # pallas_call launch + repack for tiny N.
    if total < min_kernel_elems:
        return jax.nn.sigmoid(x * w_scalar + b_scalar).reshape(orig_shape)

    # Lane-dense repack: (total,) -> (rows, 128).  Pad only if total is not
    # already a multiple of 128 (pad + un-pad are full extra HBM passes).
    pad = (-total) % LANES
    if pad:
        flat = jnp.pad(flat, (0, pad))
    rows = flat.shape[0] // LANES
    x2d = flat.reshape(rows, LANES)

    if rows <= tile_rows:
        block_rows = rows            # single full-extent block (no (8,128) constraint)
    else:
        block_rows = tile_rows       # multiple of 8; ragged last block masked by Pallas
    grid = (pl.cdiv(rows, block_rows),)

    w_s = w_scalar.reshape(1)        # -> SMEM via scalar prefetch
    b_s = b_scalar.reshape(1)        # -> SMEM via scalar prefetch

    out2d = pl.pallas_call(
        logreg_kernel,
        out_shape=jax.ShapeDtypeStruct((rows, LANES), dtype),
        grid_spec=pltpu.PrefetchScalarGridSpec(
            num_scalar_prefetch=2,
            grid=grid,
            in_specs=[
                pl.BlockSpec((block_rows, LANES), lambda i, w_ref, b_ref: (i, 0)),
            ],
            out_specs=pl.BlockSpec((block_rows, LANES), lambda i, w_ref, b_ref: (i, 0)),
        ),
        compiler_params=pltpu.CompilerParams(
            dimension_semantics=("parallel",),   # v7x: shard row grid across 2 TCs
            vmem_limit_bytes=32 << 20,           # covers v5e's 16 MiB scoped default
        ),
    )(w_s, b_s, x2d)

    out_flat = out2d.reshape(-1)
    if pad:
        out_flat = out_flat[:total]
    return out_flat.reshape(orig_shape)


if __name__ == "__main__":
    key = jax.random.PRNGKey(0)
    kx, kw, kb = jax.random.split(key, 3)

    # Deterministic Linear(1,1) parameters (PyTorch-style uniform init).
    w = jax.random.uniform(kw, (1, 1), dtype=jnp.float32, minval=-1.0, maxval=1.0)
    b = jax.random.uniform(kb, (1,), dtype=jnp.float32, minval=-1.0, maxval=1.0)

    def ref(xv):
        return jax.nn.sigmoid(xv @ w.T + b)

    # 1) Small shape typical for this module (hits the fused-XLA fallback path).
    x_small = jax.random.normal(kx, (8, 1), dtype=jnp.float32)
    y_small = logistic_regression(x_small, w, b)
    jax.block_until_ready(y_small)
    assert y_small.shape == (8, 1)
    assert jnp.allclose(y_small, ref(x_small), atol=1e-5)

    # 2) Pallas kernel path, 128-aligned (no pad / no un-pad), single block.
    x1 = jax.random.normal(kx, (2048, 1), dtype=jnp.float32)
    y1 = logistic_regression(x1, w, b, min_kernel_elems=0)
    jax.block_until_ready(y1)
    assert y1.shape == x1.shape
    assert jnp.allclose(y1, ref(x1), atol=1e-5)

    # 3) Pallas kernel path, ragged element count (minimal pad + un-pad).
    x2 = jax.random.normal(kx, (300, 1), dtype=jnp.float32)
    y2 = logistic_regression(x2, w, b, min_kernel_elems=0)
    jax.block_until_ready(y2)
    assert y2.shape == x2.shape
    assert jnp.allclose(y2, ref(x2), atol=1e-5)

    # 4) Multi-block grid with a ragged final row block (rows = 8193 > 8192).
    x3 = jax.random.normal(kx, (8193 * 128, 1), dtype=jnp.float32)
    y3 = logistic_regression(x3, w, b, min_kernel_elems=0)
    jax.block_until_ready(y3)
    assert y3.shape == x3.shape
    assert jnp.allclose(y3, ref(x3), atol=1e-5)

    print("KERNEL_OK")
</pallas_src>

<mosaic_0001>
module attributes {stable_mosaic.version = 11 : i64} {
  func.func @logreg_kernel(%arg0: i32, %arg1: memref<1xf32, #tpu.memory_space<smem>>, %arg2: memref<1xf32, #tpu.memory_space<smem>>, %arg3: memref<16x128xf32, #tpu.memory_space<vmem>>, %arg4: memref<16x128xf32, #tpu.memory_space<vmem>>) attributes {dimension_semantics = [#tpu.dimension_semantics<parallel>], iteration_bounds = array<i64: 1>, scalar_prefetch = 2 : i64, scratch_operands = 0 : i64, tpu.core_type = #tpu.core_type<tc>, window_params = [{transform_indices = @transform_0, window_bounds = array<i64: 16, 128>}, {transform_indices = @transform_1, window_bounds = array<i64: 16, 128>}]} {
    %c0 = arith.constant 0 : index
    %0 = memref.load %arg1[%c0] : memref<1xf32, #tpu.memory_space<smem>>
    %c0_0 = arith.constant 0 : index
    %1 = memref.load %arg2[%c0_0] : memref<1xf32, #tpu.memory_space<smem>>
    %c0_1 = arith.constant 0 : index
    %c0_2 = arith.constant 0 : index
    %2 = vector.load %arg3[%c0_1, %c0_2] : memref<16x128xf32, #tpu.memory_space<vmem>>, vector<16x128xf32>
    %3 = vector.broadcast %0 : f32 to vector<16x128xf32>
    %4 = arith.mulf %2, %3 : vector<16x128xf32>
    %5 = vector.broadcast %1 : f32 to vector<16x128xf32>
    %6 = arith.addf %4, %5 : vector<16x128xf32>
    %cst = arith.constant 5.000000e-01 : f32
    %7 = vector.broadcast %cst : f32 to vector<16x128xf32>
    %8 = arith.mulf %7, %6 : vector<16x128xf32>
    %9 = math.tanh %8 : vector<16x128xf32>
    %cst_3 = arith.constant 5.000000e-01 : f32
    %10 = vector.broadcast %cst_3 : f32 to vector<16x128xf32>
    %11 = arith.mulf %10, %9 : vector<16x128xf32>
    %cst_4 = arith.constant 5.000000e-01 : f32
    %12 = vector.broadcast %cst_4 : f32 to vector<16x128xf32>
    %13 = arith.addf %11, %12 : vector<16x128xf32>
    %c0_5 = arith.constant 0 : index
    %c0_6 = arith.constant 0 : index
    %14 = vector.load %arg4[%c0_5, %c0_6] : memref<16x128xf32, #tpu.memory_space<vmem>>, vector<16x128xf32>
    tpu.vector_store %arg4[%c0_5, %c0_6], %13 {strides = array<i32>} : memref<16x128xf32, #tpu.memory_space<vmem>>, vector<16x128xf32>,
    return
  }
  func.func @transform_0(%arg0: i32, %arg1: memref<1xf32, #tpu.memory_space<smem>>, %arg2: memref<1xf32, #tpu.memory_space<smem>>) -> (i32, i32) {
    %c0_i32 = arith.constant 0 : i32
    %c0_i32_0 = arith.constant 0 : i32
    return %arg0, %c0_i32 : i32, i32
  }
  func.func @transform_1(%arg0: i32, %arg1: memref<1xf32, #tpu.memory_space<smem>>, %arg2: memref<1xf32, #tpu.memory_space<smem>>) -> (i32, i32) {
    %c0_i32 = arith.constant 0 : i32
    %c0_i32_0 = arith.constant 0 : i32
    return %arg0, %c0_i32 : i32, i32
  }
}

</mosaic_0001>

<bundles_post_ra>
// kernel: tpu_custom_call.1
= control target key start
LH: loop header
LB: loop body
LE: loop exit
PB: predicated region body
PF: predicated region fallthrough
CT: control target
= control target key end

     0   :  { %10 = vsyncpa [#allocation6], 0  ;;  %s170_s0 = inlined_call_operand.<no memory space> [shape: f32[1], index: 0, kind: input, shape index: {}]   ;;  %s171_s1 = inlined_call_operand.<no memory space> [shape: f32[1], index: 1, kind: input, shape index: {}]   ;;  %s172_s2 = inlined_call_operand.hbm [shape: f32[16,128], index: 2, kind: input, shape index: {}]   ;;  %s173_s3 = inlined_call_operand.hbm [shape: f32[16,128], index: 3, kind: output, shape index: {}]  }
   0x1   :  { %11 = vsyncpa [#allocation7], 0  ;;  %s16_s14 = sshll.u32 %s172_s2, 4  ;;  %s128_s15 = smov [#allocation5]   ;;  %s17_s14 = int_to_ptr.hbm [resolvable:$true] %s16_s14 }
   0x2   :  { %s18_s16 = sshll.u32 %s128_s15, 4  ;;  %s129_s17 = smov 128   ;;  %s19_s16 = int_to_ptr.vmem [resolvable:$true] %s18_s16 }
   0x3   :  { %s130_s18 = smov 8  }
   0x4   :  { %24 = dma.hbm_to_vmem [thread:$0]  %s17_s14, 256, %s19_s16, [#allocation6], %s129_s17, %s129_s17, %s130_s18  }
   0x5   :  { %124 = dma.done.wait [#allocation6], 256  }
   0x6   :  { %125 = vsyncadd [#allocation6], 4294967040  ;;  %v33_v0 = vstv %s170_s0  ;;  %v31_v1 = vld [vmem:[#allocation5] sm:$0xff]  ;;  %v36_v2 = vstv %s171_s1  ;;  %v32_v3 = vld [vmem:[#allocation5 + $0x8] sm:$0xff]  ;;  %s131_s2 = smov [#allocation8]   ;;  %s55_s25 = sshll.u32 %s173_s3, 4  ;;  %s56_s25 = int_to_ptr.hbm [resolvable:$true] %s55_s25 }
   0x7   :  { %v34_v4 = vmul.f32 %v33_v0, %v31_v1  ;;  %v35_v5 = vmul.f32 %v33_v0, %v32_v3  ;;  %s53_s23 = sshll.u32 %s131_s2, 4  ;;  %s54_s23 = int_to_ptr.vmem [resolvable:$true] %s53_s23 }
   0x9   :  { %v37_v6 = vadd.f32 %v36_v2, %v34_v4  ;;  %v38_v7 = vadd.f32 %v36_v2, %v35_v5 }
   0xb   :  { %v39_v8 = vmul.f32 0.5, %v37_v6  ;;  %v40_v9 = vmul.f32 0.5, %v38_v7 }
   0xd   :  { %72 = vtanh.f32 %v39_v8 }
   0xe   :  { %74 = vtanh.f32 %v40_v9 }
  0x13   :  { %v73_v10 = vpop.eup %72 }
  0x14   :  { %v75_v11 = vpop.eup %74  ;;  %v43_v12 = vmul.f32 0.5, %v73_v10 }
  0x15   :  { %v44_v13 = vmul.f32 0.5, %v75_v11 }
  0x16   :  { %v45_v14 = vadd.f32 0.5, %v43_v12 }
  0x17   :  { %v46_v15 = vadd.f32 0.5, %v44_v13 }
  0x18   :  { %47 = vst [vmem:[#allocation8] sm:$0xff] %v45_v14 }
  0x19   :  { %48 = vst [vmem:[#allocation8 + $0x8] sm:$0xff] %v46_v15 }
  0x1a   :  { %61 = dma.vmem_to_hbm [thread:$0]  %s54_s23, 256, %s56_s25, [#allocation7], %s129_s17, %s129_s17, %s130_s18  }
  0x1b   :  { %126 = dma.done.wait [#allocation7], 256  }
  0x1c   :  { %127 = vsyncadd [#allocation7], 4294967040 }
  0x1d   :  { %66 = vsyncpa [#allocation6], 1 }
  0x1e   :  { %67 = vsyncpa [#allocation7], 1 }

</bundles_post_ra>
